<compile_context>
chip_gen: v6e
topology: v6e:2x2x1
jax: 0.10.0
libtpu: 0.0.40
codegen_flags: <defaults>
</compile_context>

<pallas_src>
import functools
import math

import jax
import jax.numpy as jnp
from jax.experimental import pallas as pl
from jax.experimental.pallas import tpu as pltpu


# Byte budgets per block (f32).  Normalize streams in+out (4 double-buffered
# blocks): 4 x 2 MiB = 8 MiB << 16 MiB v5e scoped-VMEM default.  Stats streams
# input only: 2 x 4 MiB = 8 MiB.  Both fit every generation without touching
# vmem_limit_bytes.
_NORM_TILE_BYTES = 2 << 20
_STATS_TILE_BYTES = 4 << 20


def _round_up(x, m):
    return ((x + m - 1) // m) * m


def _lane_fold_factor(feats):
    """Fold factor k so the folded feature dim k*feats is a multiple of 128
    (lane-dense, unmasked vst).  k == 1 when feats is already 128-aligned."""
    if feats % 128 == 0:
        return 1
    return 128 // math.gcd(feats, 128)          # == lcm(feats, 128) // feats


def _pick_row_tile(rows, feats, budget_bytes, min_steps=1):
    """Row tile: multiple of 8 (or the full extent), sized by a VMEM byte
    budget, optionally capped so the grid has >= min_steps steps (v7x has
    2 TensorCores; a single-step 'parallel' grid leaves one idle)."""
    tb = max(8, (budget_bytes // (feats * 4)) // 8 * 8)
    if min_steps > 1 and rows >= 8 * min_steps:
        tb = min(tb, _round_up(pl.cdiv(rows, min_steps), 8))
    if rows <= tb:
        return rows                              # full extent is always legal
    return tb


# ---------------------------------------------------------------------------
# Kernel 1: single-pass streamed batch statistics (shifted sums over axis 0).
# Outputs per-sublane partial sums S1 = sum(x-K), S2 = sum((x-K)^2); the O(D)
# finalize (mean / unbiased std / 1/std) is tiny one-shot glue in the wrapper.
# ---------------------------------------------------------------------------
def _stats_kernel(obs_ref, shift_ref, s1_ref, s2_ref, *,
                  n_rows, tile_rows, acc_rows):
    t = pl.program_id(0)

    @pl.when(t == 0)
    def _init():
        s1_ref[...] = jnp.zeros_like(s1_ref)
        s2_ref[...] = jnp.zeros_like(s2_ref)

    x = obs_ref[...].astype(jnp.float32)          # (TN, Df)
    c = x - shift_ref[...]                        # shifted data (K resident)

    if n_rows % tile_rows != 0:                   # trace-time: mask only if padding exists
        row = jax.lax.broadcasted_iota(jnp.int32, c.shape, 0) + t * tile_rows
        c = jnp.where(row < n_rows, c, 0.0)

    if acc_rows > 1:
        # Per-sublane partials: pure vreg (VALU) adds every step, no XLU.
        cr = c.reshape(tile_rows // acc_rows, acc_rows, c.shape[-1])
        s1_ref[...] += jnp.sum(cr, axis=0)
        s2_ref[...] += jnp.sum(cr * cr, axis=0)
    else:
        s1_ref[...] += jnp.sum(c, axis=0, keepdims=True)
        s2_ref[...] += jnp.sum(c * c, axis=0, keepdims=True)


def compute_stats(obs):
    """obs: (N, D) -> (mean, std, 1/std), each (1, D) float32.  Single-pass,
    lane-dense, VMEM-flat streamed Pallas reduction over N."""
    N, D = obs.shape
    k = _lane_fold_factor(D)
    if k > 1 and N % k == 0:
        obs_f = obs.reshape(N // k, k * D)        # free row-major reshape
    else:
        k = 1
        obs_f = obs
    Nf, Df = obs_f.shape

    # Shift K (identical per original feature across folded lane groups): the
    # first observation row.  Shifted sums keep the single pass numerically
    # stable (no E[x^2] - E[x]^2 cancellation).
    shift = jnp.tile(obs[0:1, :].astype(jnp.float32), (1, k))   # (1, Df)

    TN = _pick_row_tile(Nf, Df, _STATS_TILE_BYTES)
    NT = pl.cdiv(Nf, TN)
    acc_rows = 8 if TN % 8 == 0 else 1

    kernel = functools.partial(_stats_kernel, n_rows=Nf, tile_rows=TN,
                               acc_rows=acc_rows)
    acc_spec = pl.BlockSpec((acc_rows, Df), lambda t: (0, 0))   # VMEM-resident

    # TODO(synk): for very large N on v7x, add a leading size-2 "parallel" grid
    # axis with per-core partial accumulators so both TensorCores stream obs.
    s1, s2 = pl.pallas_call(
        kernel,
        out_shape=(jax.ShapeDtypeStruct((acc_rows, Df), jnp.float32),
                   jax.ShapeDtypeStruct((acc_rows, Df), jnp.float32)),
        grid=(NT,),
        in_specs=[pl.BlockSpec((TN, Df), lambda t: (t, 0)),
                  pl.BlockSpec((1, Df), lambda t: (0, 0))],     # K resident
        out_specs=(acc_spec, acc_spec),
        compiler_params=pltpu.CompilerParams(
            dimension_semantics=("arbitrary",)),
    )(obs_f, shift)

    # Tiny O(D) finalize, runs once in __init__: un-fold lane groups, combine
    # per-sublane partials, convert shifted sums -> mean / std / 1/std.
    s1_tot = s1.reshape(acc_rows, k, D).sum(axis=(0, 1))        # (D,)
    s2_tot = s2.reshape(acc_rows, k, D).sum(axis=(0, 1))
    shift0 = obs[0].astype(jnp.float32)
    mean = shift0 + s1_tot / N
    # torch.std default is unbiased (ddof=1): N == 1 -> nan std, zero-variance
    # feature -> inf in 1/std; both propagate exactly like the PyTorch module.
    var = (s2_tot - (s1_tot * s1_tot) / N) / (N - 1)
    std = jnp.sqrt(jnp.maximum(var, 0.0))
    inv_std = 1.0 / std
    return mean.reshape(1, D), std.reshape(1, D), inv_std.reshape(1, D)


# ---------------------------------------------------------------------------
# Kernel 2: forward normalization (x - mean) * inv_std   (the hot path)
# ---------------------------------------------------------------------------
def _normalize_kernel(x_ref, mean_ref, inv_std_ref, out_ref):
    x = x_ref[...].astype(jnp.float32)            # (TB, Df)
    out_ref[...] = ((x - mean_ref[...]) * inv_std_ref[...]).astype(out_ref.dtype)


def gaussian_normalize(x, mean_f32, inv_std_f32):
    """x: (B, Df), mean/inv_std: (1, Df) f32 already matching x's (folded)
    layout.  Row-tiled, stats resident in VMEM, 'parallel' grid for megacore."""
    B, Df = x.shape
    TB = _pick_row_tile(B, Df, _NORM_TILE_BYTES, min_steps=2)
    grid = (pl.cdiv(B, TB),)
    return pl.pallas_call(
        _normalize_kernel,
        out_shape=jax.ShapeDtypeStruct((B, Df), x.dtype),
        grid=grid,
        in_specs=[
            pl.BlockSpec((TB, Df), lambda i: (i, 0)),
            pl.BlockSpec((1, Df), lambda i: (0, 0)),   # resident in VMEM
            pl.BlockSpec((1, Df), lambda i: (0, 0)),   # resident in VMEM
        ],
        out_specs=pl.BlockSpec((TB, Df), lambda i: (i, 0)),
        compiler_params=pltpu.CompilerParams(
            dimension_semantics=("parallel",)),        # megacore on v7x
    )(x, mean_f32, inv_std_f32)


# ---------------------------------------------------------------------------
# Module-like wrapper (forward == PyTorch GaussianNormalizer.forward)
# ---------------------------------------------------------------------------
class GaussianNormalizer:
    """JAX/Pallas port of the PyTorch GaussianNormalizer."""

    def __init__(self, obs):
        N, D = obs.shape
        mean, std, inv_std = compute_stats(obs)   # f32, (1, D) each
        self._mean = mean.astype(obs.dtype)       # buffers match torch dtype
        self._std = std.astype(obs.dtype)
        self._mean_f32 = mean
        self._inv_std = inv_std                   # exact 1/std, hoisted out of hot path
        # Precompute the lane-dense folded stats ONCE (not per __call__).
        self._k = _lane_fold_factor(D)
        if self._k > 1:
            self._mean_folded = jnp.tile(mean, (1, self._k))
            self._inv_std_folded = jnp.tile(inv_std, (1, self._k))
        else:
            self._mean_folded = mean
            self._inv_std_folded = inv_std

    def __call__(self, x):
        B, D = x.shape
        if self._k > 1 and B % self._k == 0:
            # Lane-dense fold: (B, D) -> (B/k, k*D), last dim multiple of 128.
            out = gaussian_normalize(x.reshape(B // self._k, self._k * D),
                                     self._mean_folded, self._inv_std_folded)
            return out.reshape(B, D)
        # Fallback (B not divisible by k): correct, but stores are masked.
        return gaussian_normalize(x, self._mean_f32, self._inv_std)

    forward = __call__

    # Non-hot-path helpers kept as plain JAX glue (same broadcast semantics).
    def inverse(self, y):
        return y * self._std + self._mean

    def normalize_goal(self, goal):
        return (goal - self._mean_f32[0, 7:]) * self._inv_std[0, 7:]

    @property
    def mean(self):
        return self._mean[0]

    @property
    def std(self):
        return self._std[0]


# ---------------------------------------------------------------------------
if __name__ == "__main__":
    key = jax.random.PRNGKey(0)
    k_obs, k_x = jax.random.split(key)

    N, B, D = 64, 8, 32  # obs rows, forward batch, feature dim
    obs = jax.random.normal(k_obs, (N, D), dtype=jnp.float32) * 3.0 + 1.5
    x = jax.random.normal(k_x, (B, D), dtype=jnp.float32) * 3.0 + 1.5

    normalizer = GaussianNormalizer(obs)
    out = jax.block_until_ready(normalizer(x))

    # Reference check against plain JAX (torch.std is unbiased -> ddof=1).
    ref_mean = jnp.mean(obs, axis=0)
    ref_std = jnp.std(obs, axis=0, ddof=1)
    ref = (x - ref_mean) / ref_std

    assert out.shape == (B, D)
    assert jnp.allclose(normalizer.mean, ref_mean, atol=1e-5, rtol=1e-5)
    assert jnp.allclose(normalizer.std, ref_std, atol=1e-5, rtol=1e-5)
    assert jnp.allclose(out, ref, atol=1e-5, rtol=1e-5)
    # round-trip through inverse
    assert jnp.allclose(normalizer.inverse(out), x, atol=1e-4, rtol=1e-4)

    print("KERNEL_OK")
</pallas_src>

<mosaic_0001>
module attributes {stable_mosaic.version = 11 : i64} {
  func.func @_stats_kernel(%arg0: i32, %arg1: memref<16x128xf32, #tpu.memory_space<vmem>>, %arg2: memref<1x128xf32, #tpu.memory_space<vmem>>, %arg3: memref<8x128xf32, #tpu.memory_space<vmem>>, %arg4: memref<8x128xf32, #tpu.memory_space<vmem>>) attributes {dimension_semantics = [#tpu.dimension_semantics<arbitrary>], iteration_bounds = array<i64: 1>, scalar_prefetch = 0 : i64, scratch_operands = 0 : i64, tpu.core_type = #tpu.core_type<tc>, window_params = [{transform_indices = @transform_0, window_bounds = array<i64: 16, 128>}, {pipeline_mode = #tpu.pipeline_mode<synchronous>, transform_indices = @transform_1, window_bounds = array<i64: 1, 128>}, {pipeline_mode = #tpu.pipeline_mode<synchronous>, transform_indices = @transform_2, window_bounds = array<i64: 8, 128>}, {pipeline_mode = #tpu.pipeline_mode<synchronous>, transform_indices = @transform_3, window_bounds = array<i64: 8, 128>}]} {
    %c0_i32 = arith.constant 0 : i32
    %0 = arith.cmpi eq, %arg0, %c0_i32 : i32
    %1 = arith.extui %0 : i1 to i32
    %c0_i32_0 = arith.constant 0 : i32
    %2 = arith.cmpi ne, %1, %c0_i32_0 : i32
    scf.if %2 {
      %cst_13 = arith.constant 0.000000e+00 : f32
      %17 = vector.broadcast %cst_13 : f32 to vector<8x128xf32>
      %c0_14 = arith.constant 0 : index
      %c0_15 = arith.constant 0 : index
      %18 = vector.load %arg3[%c0_14, %c0_15] : memref<8x128xf32, #tpu.memory_space<vmem>>, vector<8x128xf32>
      tpu.vector_store %arg3[%c0_14, %c0_15], %17 {strides = array<i32>} : memref<8x128xf32, #tpu.memory_space<vmem>>, vector<8x128xf32>,
      %cst_16 = arith.constant 0.000000e+00 : f32
      %19 = vector.broadcast %cst_16 : f32 to vector<8x128xf32>
      %c0_17 = arith.constant 0 : index
      %c0_18 = arith.constant 0 : index
      %20 = vector.load %arg4[%c0_17, %c0_18] : memref<8x128xf32, #tpu.memory_space<vmem>>, vector<8x128xf32>
      tpu.vector_store %arg4[%c0_17, %c0_18], %19 {strides = array<i32>} : memref<8x128xf32, #tpu.memory_space<vmem>>, vector<8x128xf32>,
    } else {
    }
    %c0 = arith.constant 0 : index
    %c0_1 = arith.constant 0 : index
    %3 = vector.load %arg1[%c0, %c0_1] : memref<16x128xf32, #tpu.memory_space<vmem>>, vector<16x128xf32>
    %c0_2 = arith.constant 0 : index
    %c0_3 = arith.constant 0 : index
    %4 = vector.load %arg2[%c0_2, %c0_3] : memref<1x128xf32, #tpu.memory_space<vmem>>, vector<1x128xf32>
    %5 = vector.broadcast %4 : vector<1x128xf32> to vector<16x128xf32>
    %6 = arith.subf %3, %5 : vector<16x128xf32>
    %7 = vector.shape_cast %6 : vector<16x128xf32> to vector<2x8x128xf32>
    %c0_4 = arith.constant 0 : index
    %c0_5 = arith.constant 0 : index
    %8 = vector.load %arg3[%c0_4, %c0_5] : memref<8x128xf32, #tpu.memory_space<vmem>>, vector<8x128xf32>
    %cst = arith.constant dense<0.000000e+00> : vector<8x128xf32>
    %9 = vector.multi_reduction <add>, %7, %cst [0] : vector<2x8x128xf32> to vector<8x128xf32>
    %10 = arith.addf %8, %9 : vector<8x128xf32>
    %c0_6 = arith.constant 0 : index
    %c0_7 = arith.constant 0 : index
    %11 = vector.load %arg3[%c0_6, %c0_7] : memref<8x128xf32, #tpu.memory_space<vmem>>, vector<8x128xf32>
    tpu.vector_store %arg3[%c0_6, %c0_7], %10 {strides = array<i32>} : memref<8x128xf32, #tpu.memory_space<vmem>>, vector<8x128xf32>,
    %c0_8 = arith.constant 0 : index
    %c0_9 = arith.constant 0 : index
    %12 = vector.load %arg4[%c0_8, %c0_9] : memref<8x128xf32, #tpu.memory_space<vmem>>, vector<8x128xf32>
    %13 = arith.mulf %7, %7 : vector<2x8x128xf32>
    %cst_10 = arith.constant dense<0.000000e+00> : vector<8x128xf32>
    %14 = vector.multi_reduction <add>, %13, %cst_10 [0] : vector<2x8x128xf32> to vector<8x128xf32>
    %15 = arith.addf %12, %14 : vector<8x128xf32>
    %c0_11 = arith.constant 0 : index
    %c0_12 = arith.constant 0 : index
    %16 = vector.load %arg4[%c0_11, %c0_12] : memref<8x128xf32, #tpu.memory_space<vmem>>, vector<8x128xf32>
    tpu.vector_store %arg4[%c0_11, %c0_12], %15 {strides = array<i32>} : memref<8x128xf32, #tpu.memory_space<vmem>>, vector<8x128xf32>,
    return
  }
  func.func @transform_0(%arg0: i32) -> (i32, i32) {
    %c0_i32 = arith.constant 0 : i32
    %c0_i32_0 = arith.constant 0 : i32
    return %arg0, %c0_i32 : i32, i32
  }
  func.func @transform_1(%arg0: i32) -> (i32, i32) {
    %c0_i32 = arith.constant 0 : i32
    %c0_i32_0 = arith.constant 0 : i32
    %c0_i32_1 = arith.constant 0 : i32
    return %c0_i32, %c0_i32_0 : i32, i32
  }
  func.func @transform_2(%arg0: i32) -> (i32, i32) {
    %c0_i32 = arith.constant 0 : i32
    %c0_i32_0 = arith.constant 0 : i32
    %c0_i32_1 = arith.constant 0 : i32
    return %c0_i32, %c0_i32_0 : i32, i32
  }
  func.func @transform_3(%arg0: i32) -> (i32, i32) {
    %c0_i32 = arith.constant 0 : i32
    %c0_i32_0 = arith.constant 0 : i32
    %c0_i32_1 = arith.constant 0 : i32
    return %c0_i32, %c0_i32_0 : i32, i32
  }
}

</mosaic_0001>

<bundles_post_ra>
// kernel: tpu_custom_call.1
= control target key start
LH: loop header
LB: loop body
LE: loop exit
PB: predicated region body
PF: predicated region fallthrough
CT: control target
= control target key end

     0   :  { %9 = vsyncpa [#allocation3], 0  ;;  %s195_s0 = inlined_call_operand.hbm [shape: f32[16,128], index: 0, kind: input, shape index: {}]   ;;  %s196_s1 = inlined_call_operand.vmem [shape: f32[1,128], index: 1, kind: input, shape index: {}]   ;;  %s197_s2 = inlined_call_operand.hbm [shape: f32[8,128], index: 2, kind: output, shape index: {0}]   ;;  %s198_s3 = inlined_call_operand.hbm [shape: f32[8,128], index: 3, kind: output, shape index: {1}]  }
   0x1   :  { %10 = vsyncpa [#allocation4], 0 }
   0x2   :  { %11 = vsyncpa [#allocation7], 0  ;;  %s158_s12 = smov [#allocation2]  }
   0x3   :  { %s17_s13 = sshll.u32 %s158_s12, 4  ;;  %s18_s13 = int_to_ptr.vmem [resolvable:$true] %s17_s13 }
   0x4   :  { %s100_s14 = scalar_lea.vmem %s18_s13, 256  ;;  %p105_p1 = scmp.lt.s32.totalorder %s18_s13, %s18_s13 }
   0x5   :  { %p101_p0 = scmp.ne.s32.totalorder %s18_s13, %s100_s14  ;;  %p106_p2 = scmp.lt.s32.totalorder %s100_s14, %s100_s14 }
   0x7   :  { %p107_p3 = por %p106_p2, %p105_p1 }
   0x9   :  { %p108_p4 = pnand %p107_p3, %p101_p0 }
   0xb   :  { %111 = shalt.err (!%p108_p4)
}
   0xc   :  { %s159_s15 = smov 128   ;;  %s160_s16 = smov 8  }
   0xd   :  { %23 = dma.hbm_to_vmem [thread:$0]  %s195_s0, 256, %s18_s13, [#allocation3], %s159_s15, %s159_s15, %s160_s16  }
   0xe   :  { %152 = dma.done.wait [#allocation3], 256  }
   0xf   :  { %153 = vsyncadd [#allocation3], 4294967040  ;;  %v35_v0 = vld [vmem:[#allocation2] sm:$0xff]  ;;  %v36_v1 = vld [vmem:[#allocation2 + $0x8] sm:$0xff]  ;;  %s161_s21 = smov [#allocation5]   ;;  %s162_s23 = smov [#allocation6]  }
  0x10   :  { %v85_v2 = vld [vmem:[%s196_s1] ss:$0 sm:$0xff]  ;;  %s62_s22 = sshll.u32 %s161_s21, 4  ;;  %s72_s24 = sshll.u32 %s162_s23, 4  ;;  %s63_s22 = int_to_ptr.vmem [resolvable:$true] %s62_s22  ;;  %s73_s24 = int_to_ptr.vmem [resolvable:$true] %s72_s24 }
  0x11   :  { %v44_v3 = vsub.f32 %v35_v0, %v85_v2  ;;  %v45_v4 = vsub.f32 %v36_v1, %v85_v2  ;;  %s112_s0 = scalar_lea.vmem %s63_s22, 128  ;;  %p117_p6 = scmp.lt.s32.totalorder %s63_s22, %s63_s22 }
  0x12   :  { %p113_p5 = scmp.ne.s32.totalorder %s63_s22, %s112_s0  ;;  %p118_p7 = scmp.lt.s32.totalorder %s112_s0, %s112_s0 }
  0x13   :  { %v47_v5 = vadd.f32 %v45_v4, %v44_v3  ;;  %v51_v6 = vmul.f32 %v44_v3, %v44_v3  ;;  %v52_v7 = vmul.f32 %v45_v4, %v45_v4 }
  0x14   :  { %p119_p8 = por %p118_p7, %p117_p6 }
  0x15   :  { %v53_v8 = vadd.f32 %v52_v7, %v51_v6  ;;  %49 = vst [vmem:[#allocation5] sm:$0xff] %v47_v5 }
  0x16   :  { %p120_p9 = pnand %p119_p8, %p113_p5 }
  0x18   :  { %123 = shalt.err (!%p120_p9)
}
  0x19   :  { %65 = dma.vmem_to_hbm [thread:$0]  %s63_s22, 128, %s197_s2, [#allocation4]   ;;  %55 = vst [vmem:[#allocation6] sm:$0xff] %v53_v8 }
  0x1a   :  { %s132_s26 = scalar_lea.vmem %s73_s24, 128  ;;  %p137_p11 = scmp.lt.s32.totalorder %s73_s24, %s73_s24 }
  0x1b   :  { %p133_p10 = scmp.ne.s32.totalorder %s73_s24, %s132_s26  ;;  %p138_p12 = scmp.lt.s32.totalorder %s132_s26, %s132_s26 }
  0x1d   :  { %p139_p13 = por %p138_p12, %p137_p11 }
  0x1f   :  { %p140_p0 = pnand %p139_p13, %p133_p10 }
  0x21   :  { %143 = shalt.err (!%p140_p0)
}
  0x22   :  { %75 = dma.vmem_to_hbm [thread:$0]  %s73_s24, 128, %s198_s3, [#allocation7]  }
  0x23   :  { %154 = dma.done.wait [#allocation4], 128  }
  0x24   :  { %155 = vsyncadd [#allocation4], 4294967168 }
  0x25   :  { %156 = dma.done.wait [#allocation7], 128  }
  0x26   :  { %157 = vsyncadd [#allocation7], 4294967168 }
  0x27   :  { %82 = vsyncpa [#allocation3], 1 }
  0x28   :  { %83 = vsyncpa [#allocation4], 1 }
  0x29   :  { %84 = vsyncpa [#allocation7], 1 }

</bundles_post_ra>
